<compile_context>
chip_gen: v6e
topology: v6e:2x2x1
jax: 0.10.0
libtpu: 0.0.40
codegen_flags: <defaults>
</compile_context>

<pallas_src>
import jax
import jax.numpy as jnp
from jax.experimental import pallas as pl
from jax.experimental.pallas import tpu as pltpu

D_IN, D_H1, D_H2, D_OUT = 4, 64, 32, 3

LANE = 128
DEFAULT_TM = 8192     # sweep {4096, 8192, 16384, 32768} on real workloads


def mlp_kernel(xT_ref, w1_ref, b1_ref, w2_ref, b2_ref, w3_ref, b3_ref, o_ref):
    # xT_ref: (4, TM) f32, batch on the lane axis.  Weights (out, in) f32,
    # biases (out, 1) f32 (lane-broadcast).
    x = xT_ref[...]                                                  # (4, TM)

    # Layer 1: (64, 4) @ (4, TM) -> (64, TM), f32 accumulate on the MXU.
    h1 = jnp.dot(w1_ref[...], x, preferred_element_type=jnp.float32)
    h1 = jnp.maximum(h1 + b1_ref[...], 0.0)                          # bias + ReLU (VPU)

    # Layer 2: (32, 64) @ (64, TM) -> (32, TM)
    h2 = jnp.dot(w2_ref[...], h1, preferred_element_type=jnp.float32)
    h2 = jnp.maximum(h2 + b2_ref[...], 0.0)

    # Layer 3: (3, 32) @ (32, TM) -> (3, TM)  — lane-dense store along TM.
    h3 = jnp.dot(w3_ref[...], h2, preferred_element_type=jnp.float32)
    o_ref[...] = (h3 + b3_ref[...]).astype(o_ref.dtype)


def _choose_tm(batch, tm=None):
    """Pick the batch tile: big enough to amortize ~0.35 us/step pipeline
    overhead, small enough for v7x VMEM, and leaving >= 2 grid steps when
    possible so a 2-TC chip can shard the 'parallel' batch axis."""
    bp128 = pl.cdiv(batch, LANE) * LANE
    if tm is None:
        tm = DEFAULT_TM
        if bp128 >= 2 * LANE:
            tm = min(tm, (bp128 // (2 * LANE)) * LANE)   # keep >= 2 grid steps
    tm = (max(LANE, min(tm, bp128)) // LANE) * LANE
    return tm


def _vmem_limit_bytes(tm):
    # Per-tm-element VMEM: 2x (4,tm) f32 input bufs + 2x (3,tm) f32 output bufs
    # + (64+32, tm) f32 intermediates (counted twice for ReLU temporaries),
    # plus ~10 KB resident weights and slack.
    per_elem = 2 * (D_IN * 4) + 2 * (D_OUT * 4) + 2 * (D_H1 + D_H2) * 4
    need = per_elem * tm + (1 << 20)
    # Floor at 32 MiB (cheap everywhere, lifts v5e's 16 MiB default); cap at
    # 48 MiB to leave headroom inside v7x's 64 MiB physical VMEM.
    return int(min(48 * 2**20, max(32 * 2**20, need)))


def neural_net_forward_fm(xT, params, *, tm=None, out_dtype=jnp.float32):
    """Feature-major fast path.

    xT: (4, B) float32 (batch on the trailing axis).  Returns (3, B) out_dtype.
    No wrapper-side cast/pad/transpose when B is a multiple of the chosen tile.
    """
    d, batch = xT.shape
    assert d == D_IN, f"expected ({D_IN}, B) feature-major input, got {xT.shape}"

    tm = _choose_tm(batch, tm)
    bp = pl.cdiv(batch, tm) * tm
    if bp != batch:                       # pad only for ragged batches
        xT = jnp.pad(xT, ((0, 0), (0, bp - batch)))

    w1, b1, w2, b2, w3, b3 = (params[k] for k in ("w1", "b1", "w2", "b2", "w3", "b3"))
    resident = lambda shape: pl.BlockSpec(shape, lambda i: (0, 0))   # stays in VMEM

    outT = pl.pallas_call(
        mlp_kernel,
        out_shape=jax.ShapeDtypeStruct((D_OUT, bp), out_dtype),
        grid=(bp // tm,),
        in_specs=[
            pl.BlockSpec((D_IN, tm), lambda i: (0, i)),   # x tile, double-buffered
            resident(w1.shape), resident(b1.shape),
            resident(w2.shape), resident(b2.shape),
            resident(w3.shape), resident(b3.shape),
        ],
        out_specs=pl.BlockSpec((D_OUT, tm), lambda i: (0, i)),
        compiler_params=pltpu.CompilerParams(
            # TODO(synk): if a v7x bundle dump shows one idle TensorCore, switch
            # this axis to pltpu.CORE_PARALLEL.
            dimension_semantics=("parallel",),
            vmem_limit_bytes=_vmem_limit_bytes(tm),
        ),
    )(xT, w1, b1, w2, b2, w3, b3)

    return outT if bp == batch else outT[:, :batch]


def neural_net_forward(x, params, *, tm=None, out_dtype=jnp.float32):
    """PyTorch-layout adapter: x (B, 4) -> (B, 3).

    NOTE: this path pays one (B,4)->(4,B) and one (3,B)->(B,3) XLA transpose
    around the kernel.  Prefer neural_net_forward_fm with feature-major
    producers/consumers to keep end-to-end HBM traffic minimal.
    """
    return neural_net_forward_fm(x.T, params, tm=tm, out_dtype=out_dtype).T


def init_params(key):
    """PyTorch nn.Linear default init: U(-1/sqrt(fan_in), 1/sqrt(fan_in)).

    Weights stored (out_features, in_features) — same layout as nn.Linear —
    biases stored (out_features, 1).  All float32 (matches the f32 module).
    """
    dims = [(D_IN, D_H1), (D_H1, D_H2), (D_H2, D_OUT)]
    params = {}
    for i, (fan_in, fan_out) in enumerate(dims, start=1):
        key, kw, kb = jax.random.split(key, 3)
        bound = 1.0 / jnp.sqrt(fan_in)
        params[f"w{i}"] = jax.random.uniform(kw, (fan_out, fan_in), jnp.float32, -bound, bound)
        params[f"b{i}"] = jax.random.uniform(kb, (fan_out, 1), jnp.float32, -bound, bound)
    return params


def reference_forward_fm(xT, params):
    """Pure-JAX f32 reference, feature-major: (4, B) -> (3, B)."""
    hi = jax.lax.Precision.HIGHEST
    h1 = jnp.maximum(
        jnp.dot(params["w1"], xT, precision=hi, preferred_element_type=jnp.float32)
        + params["b1"], 0.0)
    h2 = jnp.maximum(
        jnp.dot(params["w2"], h1, precision=hi, preferred_element_type=jnp.float32)
        + params["b2"], 0.0)
    return (jnp.dot(params["w3"], h2, precision=hi, preferred_element_type=jnp.float32)
            + params["b3"])


if __name__ == "__main__":
    key = jax.random.PRNGKey(0)
    key, kx1, kx2 = jax.random.split(key, 3)
    params = init_params(key)

    # --- Primary path: feature-major end-to-end, no wrapper data movement. ---
    # B=256 -> auto tile tm=128 -> 2 grid steps (exercises the batch grid).
    B = 256
    xT = jax.random.normal(kx1, (D_IN, B), jnp.float32)
    outT = jax.block_until_ready(neural_net_forward_fm(xT, params))
    refT = reference_forward_fm(xT, params)
    assert outT.shape == (D_OUT, B)
    assert jnp.allclose(outT, refT, atol=1e-3, rtol=1e-3), "feature-major path mismatch"

    # --- PyTorch-layout adapter + ragged batch (pad/slice path). ---
    B2 = 200
    x = jax.random.normal(kx2, (B2, D_IN), jnp.float32)
    out = jax.block_until_ready(neural_net_forward(x, params))
    ref = reference_forward_fm(x.T, params).T
    assert out.shape == (B2, D_OUT)
    assert jnp.allclose(out, ref, atol=1e-3, rtol=1e-3), "PyTorch-layout path mismatch"

    print("KERNEL_OK")
</pallas_src>

<mosaic_0001>
module attributes {stable_mosaic.version = 11 : i64} {
  func.func @mlp_kernel(%arg0: i32, %arg1: memref<4x128xf32, #tpu.memory_space<vmem>>, %arg2: memref<64x4xf32, #tpu.memory_space<vmem>>, %arg3: memref<64x1xf32, #tpu.memory_space<vmem>>, %arg4: memref<32x64xf32, #tpu.memory_space<vmem>>, %arg5: memref<32x1xf32, #tpu.memory_space<vmem>>, %arg6: memref<3x32xf32, #tpu.memory_space<vmem>>, %arg7: memref<3x1xf32, #tpu.memory_space<vmem>>, %arg8: memref<3x128xf32, #tpu.memory_space<vmem>>) attributes {dimension_semantics = [#tpu.dimension_semantics<parallel>], iteration_bounds = array<i64: 2>, scalar_prefetch = 0 : i64, scratch_operands = 0 : i64, tpu.core_type = #tpu.core_type<tc>, window_params = [{transform_indices = @transform_0, window_bounds = array<i64: 4, 128>}, {pipeline_mode = #tpu.pipeline_mode<synchronous>, transform_indices = @transform_1, window_bounds = array<i64: 64, 4>}, {pipeline_mode = #tpu.pipeline_mode<synchronous>, transform_indices = @transform_2, window_bounds = array<i64: 64, 1>}, {pipeline_mode = #tpu.pipeline_mode<synchronous>, transform_indices = @transform_3, window_bounds = array<i64: 32, 64>}, {pipeline_mode = #tpu.pipeline_mode<synchronous>, transform_indices = @transform_4, window_bounds = array<i64: 32, 1>}, {pipeline_mode = #tpu.pipeline_mode<synchronous>, transform_indices = @transform_5, window_bounds = array<i64: 3, 32>}, {pipeline_mode = #tpu.pipeline_mode<synchronous>, transform_indices = @transform_6, window_bounds = array<i64: 3, 1>}, {transform_indices = @transform_7, window_bounds = array<i64: 3, 128>}]} {
    %c0 = arith.constant 0 : index
    %c0_0 = arith.constant 0 : index
    %0 = vector.load %arg1[%c0, %c0_0] : memref<4x128xf32, #tpu.memory_space<vmem>>, vector<4x128xf32>
    %c0_1 = arith.constant 0 : index
    %c0_2 = arith.constant 0 : index
    %1 = vector.load %arg2[%c0_1, %c0_2] : memref<64x4xf32, #tpu.memory_space<vmem>>, vector<64x4xf32>
    %cst = arith.constant dense<0.000000e+00> : vector<64x128xf32>
    %2 = tpu.matmul %1, %0, %cst {dimension_numbers = #tpu.dot_dimension_numbers<[1], [0], [0], [1], [0, 0, 1, 1], [], []>} : vector<64x4xf32>, vector<4x128xf32>, vector<64x128xf32> -> vector<64x128xf32>
    %c0_3 = arith.constant 0 : index
    %c0_4 = arith.constant 0 : index
    %3 = vector.load %arg3[%c0_3, %c0_4] : memref<64x1xf32, #tpu.memory_space<vmem>>, vector<64x1xf32>
    %4 = vector.broadcast %3 : vector<64x1xf32> to vector<64x128xf32>
    %5 = arith.addf %2, %4 : vector<64x128xf32>
    %cst_5 = arith.constant 0.000000e+00 : f32
    %6 = vector.broadcast %cst_5 : f32 to vector<64x128xf32>
    %7 = arith.maximumf %5, %6 : vector<64x128xf32>
    %c0_6 = arith.constant 0 : index
    %c0_7 = arith.constant 0 : index
    %8 = vector.load %arg4[%c0_6, %c0_7] : memref<32x64xf32, #tpu.memory_space<vmem>>, vector<32x64xf32>
    %cst_8 = arith.constant dense<0.000000e+00> : vector<32x128xf32>
    %9 = tpu.matmul %8, %7, %cst_8 {dimension_numbers = #tpu.dot_dimension_numbers<[1], [0], [0], [1], [0, 0, 1, 1], [], []>} : vector<32x64xf32>, vector<64x128xf32>, vector<32x128xf32> -> vector<32x128xf32>
    %c0_9 = arith.constant 0 : index
    %c0_10 = arith.constant 0 : index
    %10 = vector.load %arg5[%c0_9, %c0_10] : memref<32x1xf32, #tpu.memory_space<vmem>>, vector<32x1xf32>
    %11 = vector.broadcast %10 : vector<32x1xf32> to vector<32x128xf32>
    %12 = arith.addf %9, %11 : vector<32x128xf32>
    %cst_11 = arith.constant 0.000000e+00 : f32
    %13 = vector.broadcast %cst_11 : f32 to vector<32x128xf32>
    %14 = arith.maximumf %12, %13 : vector<32x128xf32>
    %c0_12 = arith.constant 0 : index
    %c0_13 = arith.constant 0 : index
    %15 = vector.load %arg6[%c0_12, %c0_13] : memref<3x32xf32, #tpu.memory_space<vmem>>, vector<3x32xf32>
    %cst_14 = arith.constant dense<0.000000e+00> : vector<3x128xf32>
    %16 = tpu.matmul %15, %14, %cst_14 {dimension_numbers = #tpu.dot_dimension_numbers<[1], [0], [0], [1], [0, 0, 1, 1], [], []>} : vector<3x32xf32>, vector<32x128xf32>, vector<3x128xf32> -> vector<3x128xf32>
    %c0_15 = arith.constant 0 : index
    %c0_16 = arith.constant 0 : index
    %17 = vector.load %arg7[%c0_15, %c0_16] : memref<3x1xf32, #tpu.memory_space<vmem>>, vector<3x1xf32>
    %18 = vector.broadcast %17 : vector<3x1xf32> to vector<3x128xf32>
    %19 = arith.addf %16, %18 : vector<3x128xf32>
    %c0_17 = arith.constant 0 : index
    %c0_18 = arith.constant 0 : index
    %20 = vector.load %arg8[%c0_17, %c0_18] : memref<3x128xf32, #tpu.memory_space<vmem>>, vector<3x128xf32>
    tpu.vector_store %arg8[%c0_17, %c0_18], %19 {strides = array<i32>} : memref<3x128xf32, #tpu.memory_space<vmem>>, vector<3x128xf32>,
    return
  }
  func.func @transform_0(%arg0: i32) -> (i32, i32) {
    %c0_i32 = arith.constant 0 : i32
    %c0_i32_0 = arith.constant 0 : i32
    return %c0_i32, %arg0 : i32, i32
  }
  func.func @transform_1(%arg0: i32) -> (i32, i32) {
    %c0_i32 = arith.constant 0 : i32
    %c0_i32_0 = arith.constant 0 : i32
    %c0_i32_1 = arith.constant 0 : i32
    return %c0_i32, %c0_i32_0 : i32, i32
  }
  func.func @transform_2(%arg0: i32) -> (i32, i32) {
    %c0_i32 = arith.constant 0 : i32
    %c0_i32_0 = arith.constant 0 : i32
    %c0_i32_1 = arith.constant 0 : i32
    return %c0_i32, %c0_i32_0 : i32, i32
  }
  func.func @transform_3(%arg0: i32) -> (i32, i32) {
    %c0_i32 = arith.constant 0 : i32
    %c0_i32_0 = arith.constant 0 : i32
    %c0_i32_1 = arith.constant 0 : i32
    return %c0_i32, %c0_i32_0 : i32, i32
  }
  func.func @transform_4(%arg0: i32) -> (i32, i32) {
    %c0_i32 = arith.constant 0 : i32
    %c0_i32_0 = arith.constant 0 : i32
    %c0_i32_1 = arith.constant 0 : i32
    return %c0_i32, %c0_i32_0 : i32, i32
  }
  func.func @transform_5(%arg0: i32) -> (i32, i32) {
    %c0_i32 = arith.constant 0 : i32
    %c0_i32_0 = arith.constant 0 : i32
    %c0_i32_1 = arith.constant 0 : i32
    return %c0_i32, %c0_i32_0 : i32, i32
  }
  func.func @transform_6(%arg0: i32) -> (i32, i32) {
    %c0_i32 = arith.constant 0 : i32
    %c0_i32_0 = arith.constant 0 : i32
    %c0_i32_1 = arith.constant 0 : i32
    return %c0_i32, %c0_i32_0 : i32, i32
  }
  func.func @transform_7(%arg0: i32) -> (i32, i32) {
    %c0_i32 = arith.constant 0 : i32
    %c0_i32_0 = arith.constant 0 : i32
    return %c0_i32, %arg0 : i32, i32
  }
}

</mosaic_0001>

<bundles_post_ra>
// kernel: tpu_custom_call.1
= control target key start
LH: loop header
LB: loop body
LE: loop exit
PB: predicated region body
PF: predicated region fallthrough
CT: control target
= control target key end

     0   :  { %12 = vsyncpa [#allocation3], 0  ;;  %s1188_s0 = inlined_call_operand.vmem [shape: f32[4,256], index: 0, kind: input, shape index: {}]   ;;  %s1189_s1 = inlined_call_operand.vmem [shape: f32[64,4], index: 1, kind: input, shape index: {}]   ;;  %s1190_s2 = inlined_call_operand.vmem [shape: f32[64,1], index: 2, kind: input, shape index: {}]   ;;  %s1191_s3 = inlined_call_operand.vmem [shape: f32[32,64], index: 3, kind: input, shape index: {}]   ;;  %s1192_s4 = inlined_call_operand.vmem [shape: f32[32,1], index: 4, kind: input, shape index: {}]   ;;  %s1193_s5 = inlined_call_operand.vmem [shape: f32[3,32], index: 5, kind: input, shape index: {}]   ;;  %s1194_s6 = inlined_call_operand.vmem [shape: f32[3,1], index: 6, kind: input, shape index: {}]   ;;  %s1195_s7 = inlined_call_operand.hbm [shape: f32[3,256], index: 7, kind: output, shape index: {}]  }
   0x1   :  { %14 = vsyncpa [#allocation3 + $0x1], 0  ;;  %s1005_s24 = smov 0   ;;  %s1007_s25 = smov 0  }
   0x2   :  { %s1009_s26 = smov 0   ;;  %s1011_s27 = smov 0  }
   0x3 LB: > { %s1026_s28 = sadd.s32 4294967295, %s959_s27   ;;  %s758_s29 = sadd.s32 4294967294, %s959_s27   ;;  %s959_s27 = sphi %s1011_s27, %s1201_s27   ;;  %s955_s26 = sphi %s1009_s26, %s1200_s26   ;;  %s951_s25 = sphi %s1007_s25, %s1199_s25   ;;  %s947_s24 = sphi %s1005_s24, %s1198_s24  }
   0x4   : > { %s1030_s30 = sadd.s32 1, %s959_s27   ;;  %s179_s8 = sadd.s32 1, %s955_s26 }
   0x5   : > { %s176_s9 = ssub.s32 %s959_s27, %s1030_s30  ;;  %p189_p0 = scmp.ne.s32.totalorder %s955_s26, %s951_s25 }
   0x6   : > { %p177_p1 = scmp.eq.s32.totalorder %s176_s9, 0  ;;  %p190_p2 = scmp.eq.s32.totalorder %s1026_s28, 1 }
   0x7   : > { %p195_p3 = scmp.ne.s32.totalorder %s951_s25, %s947_s24  ;;  %p196_p4 = scmp.eq.s32.totalorder %s758_s29, 1 }
   0x8   : > { %s1041_s10 = scalar_select %p177_p1, %s955_s26, %s179_s8  }
   0x9   : > { %p1043_p5 = por %p190_p2, %p189_p0  ;;  %p1047_p6 = por %p196_p4, %p195_p3 }
   0xa   : > { %p761_p7 = scmp.ge.s32.totalorder %s959_s27, 1  ;;  %p239_p8 = scmp.lt.s32.totalorder %s959_s27, 3 }
   0xc   : > { %p240_p9 = pnand %p761_p7, %p239_p8 }
   0xd   : > { %p270_p10 = scmp.lt.s32.totalorder (!%p240_p9), %s1026_s28, 1  ;;  %s267_s14 = sand.u32 (!%p240_p9), 1, %s951_s25  }
   0xe   : > { %243 = sbr.rel (%p240_p9) target bundleno = 667 (0x29b), region = 48  ;;  %s762_s16 = sshll.u32 (!%p240_p9), %s267_s14, 2 }
   0xf   : > { %s269_s17 = scalar_lea.vmem (!%p240_p9), [#allocation2], %s762_s16  ;;  %s686_s22 = scalar_lea.sflag (!%p240_p9), [#allocation3], %s267_s14 }
  0x10   : > { %s699_s18 = sshll.u32 (!%p240_p9), %s269_s17, 4  ;;  %s700_s18 = int_to_ptr.vmem [resolvable:$true] %s699_s18 }
  0x11   : > { %s899_s23 = scalar_lea.vmem (!%p240_p9), %s700_s18, 64 }
  0x12   : > { %p900_p11 = scmp.ne.s32.totalorder (!%p240_p9), %s700_s18, %s899_s23 }
  0x13   : > { %v275_v0 = vld [vmem:[%s1189_s1] sm:$0xff]  ;;  %vm331_vm0 = vcmask 31744   ;;  %s271_s15 = scalar_select %p270_p10, %s1026_s28, 1  ;;  %v961_v1 = vmov 0   ;;  %v290_v2 = vld [vmem:[%s1190_s2 + $0x38] sm:$0xff]  ;;  %v288_v3 = vld [vmem:[%s1190_s2 + $0x28] sm:$0xff] }
  0x14   : > { %810 = vmatprep.mubr.msk.f32.mxu0 %vm331_vm0, %v275_v0  ;;  %897 = vset.pattern.permute.xlu0 %v961_v1  ;;  %vm356_vm1 = vcmask 1043456   ;;  %v289_v4 = vld [vmem:[%s1190_s2 + $0x30] sm:$0xff]  ;;  %v287_v5 = vld [vmem:[%s1190_s2 + $0x20] sm:$0xff]  ;;  %v276_v7 = vld [vmem:[%s1189_s1 + $0x8] sm:$0xff]  ;;  %vm501_vm2 = vcmask 523264   ;;  %v962_v59 = vmov 0.0   ;;  %p901_p12 = pnand %p900_p11, %p1043_p5 }
  0x15   : > { %898 = vset.pattern.permute.xlu1 %v961_v1  ;;  %328 = vperm.xlu0 %897, %v290_v2   ;;  %s763_s20 = sshll.u32 %s271_s15, 2  ;;  %v277_v8 = vld [vmem:[%s1189_s1 + $0x10] sm:$0xff]  ;;  %v286_v9 = vld [vmem:[%s1190_s2 + $0x18] sm:$0xff]  ;;  %v279_v12 = vld [vmem:[%s1189_s1 + $0x20] sm:$0xff]  ;;  %vm963_vm3 = vmmov 0   ;;  %vm610_vm4 = vcmask 261120  }
  0x16   : > { %318 = vperm.xlu1 %898, %v288_v3   ;;  %s273_s8 = scalar_lea.vmem %s1188_s0, %s763_s20  ;;  %v285_v10 = vld [vmem:[%s1190_s2 + $0x10] sm:$0xff]  ;;  %v278_v11 = vld [vmem:[%s1189_s1 + $0x18] sm:$0xff]  ;;  %v284_v13 = vld [vmem:[%s1190_s2 + $0x8] sm:$0xff]  ;;  %s779_s15 = sshll.u32 %s1026_s28, 6 }
  0x17   : > { %v274_v6 = vld [vmem:[%s273_s8] sm:$0xf]  ;;  %v280_v15 = vld [vmem:[%s1189_s1 + $0x28] sm:$0xff]  ;;  %v281_v16 = vld [vmem:[%s1189_s1 + $0x30] sm:$0xff]  ;;  %s1153_s21 = scalar_lea.hbm %s1195_s7, %s779_s15  ;;  %p902_p13 = pneg %p901_p12 }
  0x18   : > { %808 = vmatprep.subr.msk.mxu0 %vm356_vm1, %v274_v6  ;;  %v283_v14 = vld [vmem:[%s1190_s2] sm:$0xff]  ;;  %v480_v17 = vld [vmem:[%s1192_s4 + $0x18] sm:$0xff]  ;;  %v479_v18 = vld [vmem:[%s1192_s4 + $0x10] sm:$0xff]  ;;  %s964_s28 = smov [#allocation2]  }
  0x19   : > { %323 = vperm.xlu0 %897, %v289_v4   ;;  %809 = vmatpush3.msk.msra.mxu0 %vm356_vm1, %v274_v6  ;;  %v282_v19 = vld [vmem:[%s1189_s1 + $0x38] sm:$0xff]  ;;  %v478_v20 = vld [vmem:[%s1192_s4 + $0x8] sm:$0xff]  ;;  %v477_v21 = vld [vmem:[%s1192_s4] sm:$0xff]  ;;  %s903_s29 = sshll.u32 %s964_s28, 4  ;;  %s904_s29 = int_to_ptr.vmem [resolvable:$false] %s903_s29 }
  0x1a   : > { %313 = vperm.xlu1 %898, %v287_v5   ;;  %811 = vmatmul.mubr.msk.f32.vlgmr.msra.gmra.mxu0 %vm331_vm0, %v276_v7  ;;  %v604_v22 = vld [vmem:[%s1194_s6] sm:$0x7]  ;;  %v474_v56 = vld [vmem:[%s1191_s3 + $0x8] sm:$0xff]  ;;  %v475_v57 = vld [vmem:[%s1191_s3 + $0x10] sm:$0xff]  ;;  %s905_s8 = scalar_lea.vmem %s904_s29, 128  ;;  %p906_p0 = scmp.lt.s32.totalorder %s700_s18, %s904_s29 }
  0x1b   : > { %813 = vmatprep.mubr.msk.f32.mxu0 %vm331_vm0, %v277_v8  ;;  %v473_v23 = vld [vmem:[%s1191_s3] sm:$0xff]  ;;  %v476_v58 = vld [vmem:[%s1191_s3 + $0x18] sm:$0xff]  ;;  %844 = vmatprep.subr.mxu0 %v962_v59  ;;  %p907_p1 = scmp.lt.s32.totalorder %s905_s8, %s899_s23 }
  0x1c   : > { %838 = vmatprep.mubr.msk.f32.mxu1 %vm501_vm2, %v473_v23 }
  0x1d   : > { %308 = vperm.xlu0 %897, %v286_v9   ;;  %p908_p2 = por %p907_p1, %p906_p0 }
  0x1e   : > { %303 = vperm.xlu1 %898, %v285_v10   ;;  %814 = vmatmul.mubr.msk.f32.gmra.mxu0 %vm331_vm0, %v278_v11 }
  0x1f   : > { %816 = vmatprep.mubr.msk.f32.mxu0 %vm331_vm0, %v279_v12  ;;  %v603_v12 = vld [vmem:[%s1193_s5] sm:$0x7]  ;;  %p909_p3 = pnand %p908_p2, %p902_p13 }
  0x21   : > { %298 = vperm.xlu0 %897, %v284_v13  }
  0x22   : > { %293 = vperm.xlu1 %898, %v283_v14   ;;  %817 = vmatmul.mubr.msk.f32.gmra.mxu0 %vm331_vm0, %v280_v15 }
  0x23   : > { %819 = vmatprep.mubr.msk.f32.mxu0 %vm331_vm0, %v281_v16 }
  0x25   : > { %498 = vperm.xlu0 %897, %v480_v17  }
  0x26   : > { %493 = vperm.xlu1 %898, %v479_v18   ;;  %820 = vmatmul.mubr.msk.f32.gmra.mxu0 %vm331_vm0, %v282_v19 }
  0x27   : > { %852 = vmatprep.mubr.msk.f32.mxu0 %vm963_vm3, %v962_v59 }
  0x29   : > { %488 = vperm.xlu0 %897, %v478_v20  }
  0x2a   : > { %483 = vperm.xlu1 %898, %v477_v21  }
  0x2d   : > { %607 = vperm.xlu0 %897, %v604_v22  }
  0x90   : > { %v329_v26 = vpop.permute.xlu0 %328 }
  0x91   : > { %v319_v27 = vpop.permute.xlu1 %318 }
  0x94   : > { %v324_v31 = vpop.permute.xlu0 %323 }
  0x95   : > { %v314_v32 = vpop.permute.xlu1 %313 }
  0x98   : > { %v309_v40 = vpop.permute.xlu0 %308 }
  0x99   : > { %v304_v41 = vpop.permute.xlu1 %303 }
  0x9c   : > { %v299_v48 = vpop.permute.xlu0 %298 }
  0x9d   : > { %v294_v49 = vpop.permute.xlu1 %293 }
  0xa0   : > { %v499_v60 = vpop.permute.xlu0 %498 }
  0xa1   : > { %v494_v62 = vpop.permute.xlu1 %493 }
  0xa4   : > { %v489_v2 = vpop.permute.xlu0 %488 }
  0xa5   : > { %v484_v7 = vpop.permute.xlu1 %483 }
  0xa8   : > { %v608_v13 = vpop.permute.xlu0 %607 }
  0xda   : > { %v812_v24 = vpop.f32.mrf.mxu0 }
  0xdb   : > { %v432_v50 = vadd.f32 %v812_v24, %v299_v48 }
  0xdc   : > { %v426_v25 = vpop.f32.mrf.mxu0 }
  0xdd   : > { %v427_v52 = vadd.f32 %v426_v25, %v294_v49  ;;  %v466_v54 = vmax.f32 %v432_v50, 0.0 }
  0xde   : > { %v815_v28 = vpop.f32.mrf.mxu0 }
  0xdf   : > { %v442_v44 = vadd.f32 %v815_v28, %v309_v40  ;;  %v465_v55 = vmax.f32 %v427_v52, 0.0 }
  0xe0   : > { %v436_v29 = vpop.f32.mrf.mxu0 }
  0xe1   : > { %v437_v46 = vadd.f32 %v436_v29, %v304_v41  ;;  %v468_v51 = vmax.f32 %v442_v44, 0.0 }
  0xe2   : > { %v818_v30 = vpop.f32.mrf.mxu0 }
  0xe3   : > { %v452_v37 = vadd.f32 %v818_v30, %v319_v27  ;;  %v467_v53 = vmax.f32 %v437_v46, 0.0 }
  0xe4   : > { %v446_v33 = vpop.f32.mrf.mxu0 }
  0xe5   : > { %v447_v42 = vadd.f32 %v446_v33, %v314_v32  ;;  %v470_v45 = vmax.f32 %v452_v37, 0.0 }
  0xe6   : > { %v821_v34 = vpop.f32.mrf.mxu0 }
  0xe7   : > { %v462_v35 = vadd.f32 %v821_v34, %v329_v26  ;;  %v469_v47 = vmax.f32 %v447_v42, 0.0 }
  0xe8   : > { %v456_v36 = vpop.f32.mrf.mxu0 }
  0xe9   : > { %v472_v38 = vmax.f32 %v462_v35, 0.0  ;;  %v457_v39 = vadd.f32 %v456_v36, %v324_v31 }
  0xeb   : > { %v471_v43 = vmax.f32 %v457_v39, 0.0  ;;  %822 = vmatprep.subr.mxu1 %v472_v38 }
  0xec   : > { %823 = vmatpush3.msra.mxu1 %v472_v38 }
  0xed   : > { %824 = vmatprep.subr.mxu1 %v471_v43 }
  0xee   : > { %825 = vmatpush3.msra.mxu1 %v471_v43 }
  0xef   : > { %826 = vmatprep.subr.mxu1 %v470_v45 }
  0xf0   : > { %827 = vmatpush3.msra.mxu1 %v470_v45 }
  0xf1   : > { %828 = vmatprep.subr.mxu1 %v469_v47 }
  0xf2   : > { %829 = vmatpush3.msra.mxu1 %v469_v47 }
  0xf3   : > { %830 = vmatprep.subr.mxu1 %v468_v51 }
  0xf4   : > { %831 = vmatpush3.msra.mxu1 %v468_v51 }
  0xf5   : > { %832 = vmatprep.subr.mxu1 %v467_v53 }
  0xf6   : > { %833 = vmatpush3.msra.mxu1 %v467_v53 }
  0xf7   : > { %834 = vmatprep.subr.mxu1 %v466_v54 }
  0xf8   : > { %835 = vmatpush3.msra.mxu1 %v466_v54 }
  0xf9   : > { %836 = vmatprep.subr.mxu1 %v465_v55 }
  0xfa   : > { %837 = vmatpush3.msra.mxu1 %v465_v55 }
  0xfb   : > { %839 = vmatmul.mubr.msk.f32.vlgmr.msra.gmra.mxu1 %vm501_vm2, %v474_v56 }
  0xfc   : > { %841 = vmatprep.mubr.msk.f32.mxu1 %vm501_vm2, %v475_v57 }
  0xff   : > { %842 = vmatmul.mubr.msk.f32.gmra.mxu1 %vm501_vm2, %v476_v58 }
 0x1bb   : > { %v840_v61 = vpop.f32.mrf.mxu1 }
 0x1bc   : > { %v586_v4 = vadd.f32 %v840_v61, %v489_v2 }
 0x1bd   : > { %v580_v63 = vpop.f32.mrf.mxu1 }
 0x1be   : > { %v581_v8 = vadd.f32 %v580_v63, %v484_v7  ;;  %v600_v10 = vmax.f32 %v586_v4, 0.0 }
 0x1bf   : > { %v843_v0 = vpop.f32.mrf.mxu1 }
 0x1c0   : > { %v596_v1 = vadd.f32 %v843_v0, %v499_v60  ;;  %v599_v11 = vmax.f32 %v581_v8, 0.0 }
 0x1c1   : > { %v590_v3 = vpop.f32.mrf.mxu1 }
 0x1c2   : > { %v602_v5 = vmax.f32 %v596_v1, 0.0  ;;  %v591_v6 = vadd.f32 %v590_v3, %v494_v62 }
 0x1c4   : > { %v601_v9 = vmax.f32 %v591_v6, 0.0  ;;  %845 = vmatpush3.msra.mxu0 %v602_v5 }
 0x1c5   : > { %846 = vmatprep.subr.mxu0 %v962_v59 }
 0x1c6   : > { %847 = vmatpush3.msra.mxu0 %v601_v9 }
 0x1c7   : > { %848 = vmatprep.subr.mxu0 %v962_v59 }
 0x1c8   : > { %849 = vmatpush3.msra.mxu0 %v600_v10 }
 0x1c9   : > { %850 = vmatprep.subr.mxu0 %v962_v59 }
 0x1ca   : > { %851 = vmatpush3.msra.mxu0 %v599_v11 }
 0x1cb   : > { %853 = vmatmul.mubr.msk.f32.vlgmr.msra.gmra.mxu0 %vm610_vm4, %v603_v12 }
 0x28b   : > { %v680_v14 = vpop.f32.mrf.mxu0 }
 0x28c   : > { %v681_v15 = vadd.f32 %v680_v14, %v608_v13 }
 0x28d   : > { %v854_v16 = vpop.f32.mrf.mxu0 }
 0x28e   : > { %684 = vst [vmem:[%s269_s17] sm:$0x7] %v681_v15 }
 0x28f   : > { %912 = shalt.err (!%p909_p3)
}
 0x290   : > { %s913_s9 = scalar_lea.hbm %s1153_s21, 64  ;;  %s917_s16 = scalar_lea.hbm %s1195_s7, 128 }
 0x291   : > { %p914_p4 = scmp.ne.s32.totalorder %s1153_s21, %s913_s9  ;;  %p918_p9 = scmp.lt.s32.totalorder %s1153_s21, %s1195_s7 }
 0x292   : > { %p919_p10 = scmp.lt.s32.totalorder %s917_s16, %s913_s9 }
 0x293   : > { %p915_p7 = pnand %p914_p4, %p1043_p5 }
 0x294   : > { %p920_p11 = por %p919_p10, %p918_p9 }
 0x295   : > { %p916_p8 = pneg %p915_p7 }
 0x297   : > { %p921_p12 = pnand %p920_p11, %p916_p8 }
 0x299   : > { %924 = shalt.err (!%p921_p12)
}
 0x29a   : > { %855 = dma.vmem_to_hbm [thread:$0]  (%p1043_p5), %s700_s18, 64, %s1153_s21, %s686_s22  }
 0x29b PF: > { %p861_p13 = scmp.ge.s32.totalorder %s959_s27, 2  ;;  %s711_s19 = sand.u32 1, %s947_s24  }
 0x29c   : > { %s712_s20 = scalar_lea.sflag [#allocation3], %s711_s19 }
 0x29d   : > { %p858_p0 = pnand %p861_p13, %p1047_p6 }
 0x29f   : > { %p859_p1 = pneg %p858_p0 }
 0x2a1   : > { %942 = dma.done.wait (%p859_p1), %s712_s20, 64  }
 0x2a2   : > { %944 = vsyncadd (%p859_p1), %s712_s20, 4294967232  ;;  %p17_p2 = scmp.ge.s32.totalorder %s1030_s30, 4   ;;  %s1198_s24 = smov %s951_s25 }
 0x2a3   : > { %s1199_s25 = smov %s955_s26  ;;  %s1200_s26 = smov %s1041_s10 }
 0x2a4   : > { %s1201_s27 = smov %s1030_s30  ;;  %19 = sbr.rel (!%p17_p2) target bundleno = 3 (0x3), region = 83 }
 0x2a9   :  { %717 = vsyncpa [#allocation3], 1 }
 0x2aa   :  { %719 = vsyncpa [#allocation3 + $0x1], 1 }

</bundles_post_ra>
